<compile_context>
chip_gen: v6e
topology: v6e:2x2x1
jax: 0.10.0
libtpu: 0.0.40
codegen_flags: <defaults>
</compile_context>

<pallas_src>
import functools

import jax
import jax.numpy as jnp
from jax.experimental import pallas as pl
from jax.experimental.pallas import tpu as pltpu

INPUT_DIM = 32
HIDDEN1, HIDDEN2, HIDDEN3 = 512, 256, 128
NUM_CLASSES = 3
BATCH = 8

LANE = 128            # lane width: pad the logits dim to this
SUBLANE_BF16 = 16     # bf16 sublane packing: pad batch rows to a multiple of this
MAX_ROW_TILE = 256    # rows per grid step for large batches


def _round_up(a, b):
    return ((a + b - 1) // b) * b


def mlp_kernel(x_ref, w1_ref, b1_ref, w2_ref, b2_ref, w3_ref, b3_ref,
               w4_ref, b4_ref, o_ref):
    # fc1 + relu   (dropout = identity in eval mode)
    h = jnp.dot(x_ref[...], w1_ref[...], preferred_element_type=jnp.float32)
    h = jnp.maximum(h + b1_ref[...], 0.0).astype(jnp.bfloat16)
    # fc2 + relu
    h = jnp.dot(h, w2_ref[...], preferred_element_type=jnp.float32)
    h = jnp.maximum(h + b2_ref[...], 0.0).astype(jnp.bfloat16)
    # fc3 + relu
    h = jnp.dot(h, w3_ref[...], preferred_element_type=jnp.float32)
    h = jnp.maximum(h + b3_ref[...], 0.0).astype(jnp.bfloat16)
    # fc4 (logits, lane-dense: padded to 128 columns, no activation)
    h = jnp.dot(h, w4_ref[...], preferred_element_type=jnp.float32)
    o_ref[...] = (h + b4_ref[...]).astype(o_ref.dtype)


@functools.partial(jax.jit, static_argnames=("row_tile",))
def simple_nn_forward(x, params, *, row_tile=MAX_ROW_TILE):
    (w1, b1, w2, b2, w3, b3, w4, b4) = params
    batch, in_dim = x.shape
    num_classes = w4.shape[1]
    padded_classes = _round_up(num_classes, LANE)        # 3 -> 128 (lane-dense)

    # --- lane-dense final layer: zero-pad w4/b4 columns (numerically exact) ---
    w4p = jnp.zeros((w4.shape[0], padded_classes), w4.dtype).at[:, :num_classes].set(w4)
    b4p = jnp.zeros((1, padded_classes), b4.dtype).at[:, :num_classes].set(b4)

    # --- bf16 weights/activations, f32 accumulation in-kernel ---
    xb = x.astype(jnp.bfloat16)
    w1b = w1.astype(jnp.bfloat16)
    w2b = w2.astype(jnp.bfloat16)
    w3b = w3.astype(jnp.bfloat16)
    w4b = w4p.astype(jnp.bfloat16)

    # --- pad batch to a bf16-sublane-friendly row tile and grid over it ---
    tile = min(row_tile, _round_up(batch, SUBLANE_BF16))
    padded_batch = _round_up(batch, tile)
    if padded_batch != batch:
        xb = jnp.pad(xb, ((0, padded_batch - batch), (0, 0)))
    grid = (padded_batch // tile,)

    # weights/biases: full-block, constant index_map -> VMEM-resident across steps
    def const_map(i):
        return (0, 0)

    def row_map(i):
        return (i, 0)

    in_specs = [
        pl.BlockSpec((tile, in_dim), row_map),                 # x tile
        pl.BlockSpec(w1b.shape, const_map),
        pl.BlockSpec(b1.shape, const_map),
        pl.BlockSpec(w2b.shape, const_map),
        pl.BlockSpec(b2.shape, const_map),
        pl.BlockSpec(w3b.shape, const_map),
        pl.BlockSpec(b3.shape, const_map),
        pl.BlockSpec(w4b.shape, const_map),
        pl.BlockSpec(b4p.shape, const_map),
    ]
    out_specs = pl.BlockSpec((tile, padded_classes), row_map)  # lane-dense output

    flops = 2 * padded_batch * (in_dim * HIDDEN1 + HIDDEN1 * HIDDEN2
                                + HIDDEN2 * HIDDEN3 + HIDDEN3 * padded_classes)
    bytes_accessed = (
        xb.size * 2
        + (w1b.size + w2b.size + w3b.size + w4b.size) * 2
        + (b1.size + b2.size + b3.size + b4p.size) * 4
        + padded_batch * padded_classes * 4
    )

    out = pl.pallas_call(
        mlp_kernel,
        out_shape=jax.ShapeDtypeStruct((padded_batch, padded_classes), jnp.float32),
        grid_spec=pltpu.PrefetchScalarGridSpec(
            num_scalar_prefetch=0,
            grid=grid,
            in_specs=in_specs,
            out_specs=out_specs,
        ),
        compiler_params=pltpu.CompilerParams(
            dimension_semantics=("parallel",),   # megacore / both TCs on v7x
        ),
        cost_estimate=pl.CostEstimate(
            flops=flops, transcendentals=0, bytes_accessed=bytes_accessed),
    )(xb, w1b, b1, w2b, b2, w3b, b3, w4b, b4p)

    return out[:batch, :num_classes]


def init_params(key, input_dim, num_classes):
    """Deterministic init mimicking nn.Linear (uniform(-1/sqrt(fan_in), +))."""
    dims = [(input_dim, HIDDEN1), (HIDDEN1, HIDDEN2),
            (HIDDEN2, HIDDEN3), (HIDDEN3, num_classes)]
    params = []
    for (fan_in, fan_out) in dims:
        key, kw, kb = jax.random.split(key, 3)
        bound = 1.0 / jnp.sqrt(float(fan_in))
        w = jax.random.uniform(kw, (fan_in, fan_out), jnp.float32,
                               minval=-bound, maxval=bound)
        b = jax.random.uniform(kb, (1, fan_out), jnp.float32,
                               minval=-bound, maxval=bound)
        params.extend([w, b])
    return tuple(params)


def ref_forward(x, params):
    """Plain-JAX reference matching the kernel's bf16/f32-accumulate path."""
    w1, b1, w2, b2, w3, b3, w4, b4 = params
    h = x.astype(jnp.bfloat16)
    for (w, b, act) in ((w1, b1, True), (w2, b2, True), (w3, b3, True), (w4, b4, False)):
        h = jnp.dot(h, w.astype(jnp.bfloat16), preferred_element_type=jnp.float32) + b
        if act:
            h = jnp.maximum(h, 0.0).astype(jnp.bfloat16)
    return h


if __name__ == "__main__":
    key = jax.random.PRNGKey(0)
    key, kx = jax.random.split(key)
    x = jax.random.normal(kx, (BATCH, INPUT_DIM), jnp.float32)
    params = init_params(key, INPUT_DIM, NUM_CLASSES)

    out = simple_nn_forward(x, params)
    jax.block_until_ready(out)
    assert out.shape == (BATCH, NUM_CLASSES), out.shape

    ref = ref_forward(x, params)
    assert jnp.allclose(out, ref, atol=2e-2, rtol=2e-2), float(
        jnp.max(jnp.abs(out - ref)))

    print("KERNEL_OK")
</pallas_src>

<mosaic_0001>
module attributes {stable_mosaic.version = 11 : i64} {
  func.func @mlp_kernel(%arg0: i32, %arg1: memref<16x32xbf16, #tpu.memory_space<vmem>>, %arg2: memref<32x512xbf16, #tpu.memory_space<vmem>>, %arg3: memref<1x512xf32, #tpu.memory_space<vmem>>, %arg4: memref<512x256xbf16, #tpu.memory_space<vmem>>, %arg5: memref<1x256xf32, #tpu.memory_space<vmem>>, %arg6: memref<256x128xbf16, #tpu.memory_space<vmem>>, %arg7: memref<1x128xf32, #tpu.memory_space<vmem>>, %arg8: memref<128x128xbf16, #tpu.memory_space<vmem>>, %arg9: memref<1x128xf32, #tpu.memory_space<vmem>>, %arg10: memref<16x128xf32, #tpu.memory_space<vmem>>) attributes {dimension_semantics = [#tpu.dimension_semantics<parallel>], iteration_bounds = array<i64: 1>, scalar_prefetch = 0 : i64, scratch_operands = 0 : i64, tpu.core_type = #tpu.core_type<tc>, window_params = [{transform_indices = @transform_0, window_bounds = array<i64: 16, 32>}, {pipeline_mode = #tpu.pipeline_mode<synchronous>, transform_indices = @transform_1, window_bounds = array<i64: 32, 512>}, {pipeline_mode = #tpu.pipeline_mode<synchronous>, transform_indices = @transform_2, window_bounds = array<i64: 1, 512>}, {pipeline_mode = #tpu.pipeline_mode<synchronous>, transform_indices = @transform_3, window_bounds = array<i64: 512, 256>}, {pipeline_mode = #tpu.pipeline_mode<synchronous>, transform_indices = @transform_4, window_bounds = array<i64: 1, 256>}, {pipeline_mode = #tpu.pipeline_mode<synchronous>, transform_indices = @transform_5, window_bounds = array<i64: 256, 128>}, {pipeline_mode = #tpu.pipeline_mode<synchronous>, transform_indices = @transform_6, window_bounds = array<i64: 1, 128>}, {pipeline_mode = #tpu.pipeline_mode<synchronous>, transform_indices = @transform_7, window_bounds = array<i64: 128, 128>}, {pipeline_mode = #tpu.pipeline_mode<synchronous>, transform_indices = @transform_8, window_bounds = array<i64: 1, 128>}, {transform_indices = @transform_9, window_bounds = array<i64: 16, 128>}]} {
    %c0 = arith.constant 0 : index
    %c0_0 = arith.constant 0 : index
    %0 = vector.load %arg1[%c0, %c0_0] : memref<16x32xbf16, #tpu.memory_space<vmem>>, vector<16x32xbf16>
    %c0_1 = arith.constant 0 : index
    %c0_2 = arith.constant 0 : index
    %1 = vector.load %arg2[%c0_1, %c0_2] : memref<32x512xbf16, #tpu.memory_space<vmem>>, vector<32x512xbf16>
    %cst = arith.constant dense<0.000000e+00> : vector<16x512xf32>
    %2 = tpu.matmul %0, %1, %cst {dimension_numbers = #tpu.dot_dimension_numbers<[1], [0], [0], [1], [0, 0, 1, 1], [], []>} : vector<16x32xbf16>, vector<32x512xbf16>, vector<16x512xf32> -> vector<16x512xf32>
    %c0_3 = arith.constant 0 : index
    %c0_4 = arith.constant 0 : index
    %3 = vector.load %arg3[%c0_3, %c0_4] : memref<1x512xf32, #tpu.memory_space<vmem>>, vector<1x512xf32>
    %4 = vector.broadcast %3 : vector<1x512xf32> to vector<16x512xf32>
    %5 = arith.addf %2, %4 : vector<16x512xf32>
    %cst_5 = arith.constant 0.000000e+00 : f32
    %6 = vector.broadcast %cst_5 : f32 to vector<16x512xf32>
    %7 = arith.maximumf %5, %6 : vector<16x512xf32>
    %8 = arith.truncf %7 : vector<16x512xf32> to vector<16x512xbf16>
    %c0_6 = arith.constant 0 : index
    %c0_7 = arith.constant 0 : index
    %9 = vector.load %arg4[%c0_6, %c0_7] : memref<512x256xbf16, #tpu.memory_space<vmem>>, vector<512x256xbf16>
    %cst_8 = arith.constant dense<0.000000e+00> : vector<16x256xf32>
    %10 = tpu.matmul %8, %9, %cst_8 {dimension_numbers = #tpu.dot_dimension_numbers<[1], [0], [0], [1], [0, 0, 1, 1], [], []>} : vector<16x512xbf16>, vector<512x256xbf16>, vector<16x256xf32> -> vector<16x256xf32>
    %c0_9 = arith.constant 0 : index
    %c0_10 = arith.constant 0 : index
    %11 = vector.load %arg5[%c0_9, %c0_10] : memref<1x256xf32, #tpu.memory_space<vmem>>, vector<1x256xf32>
    %12 = vector.broadcast %11 : vector<1x256xf32> to vector<16x256xf32>
    %13 = arith.addf %10, %12 : vector<16x256xf32>
    %cst_11 = arith.constant 0.000000e+00 : f32
    %14 = vector.broadcast %cst_11 : f32 to vector<16x256xf32>
    %15 = arith.maximumf %13, %14 : vector<16x256xf32>
    %16 = arith.truncf %15 : vector<16x256xf32> to vector<16x256xbf16>
    %c0_12 = arith.constant 0 : index
    %c0_13 = arith.constant 0 : index
    %17 = vector.load %arg6[%c0_12, %c0_13] : memref<256x128xbf16, #tpu.memory_space<vmem>>, vector<256x128xbf16>
    %cst_14 = arith.constant dense<0.000000e+00> : vector<16x128xf32>
    %18 = tpu.matmul %16, %17, %cst_14 {dimension_numbers = #tpu.dot_dimension_numbers<[1], [0], [0], [1], [0, 0, 1, 1], [], []>} : vector<16x256xbf16>, vector<256x128xbf16>, vector<16x128xf32> -> vector<16x128xf32>
    %c0_15 = arith.constant 0 : index
    %c0_16 = arith.constant 0 : index
    %19 = vector.load %arg7[%c0_15, %c0_16] : memref<1x128xf32, #tpu.memory_space<vmem>>, vector<1x128xf32>
    %20 = vector.broadcast %19 : vector<1x128xf32> to vector<16x128xf32>
    %21 = arith.addf %18, %20 : vector<16x128xf32>
    %cst_17 = arith.constant 0.000000e+00 : f32
    %22 = vector.broadcast %cst_17 : f32 to vector<16x128xf32>
    %23 = arith.maximumf %21, %22 : vector<16x128xf32>
    %24 = arith.truncf %23 : vector<16x128xf32> to vector<16x128xbf16>
    %c0_18 = arith.constant 0 : index
    %c0_19 = arith.constant 0 : index
    %25 = vector.load %arg8[%c0_18, %c0_19] : memref<128x128xbf16, #tpu.memory_space<vmem>>, vector<128x128xbf16>
    %cst_20 = arith.constant dense<0.000000e+00> : vector<16x128xf32>
    %26 = tpu.matmul %24, %25, %cst_20 {dimension_numbers = #tpu.dot_dimension_numbers<[1], [0], [0], [1], [0, 0, 1, 1], [], []>} : vector<16x128xbf16>, vector<128x128xbf16>, vector<16x128xf32> -> vector<16x128xf32>
    %c0_21 = arith.constant 0 : index
    %c0_22 = arith.constant 0 : index
    %27 = vector.load %arg9[%c0_21, %c0_22] : memref<1x128xf32, #tpu.memory_space<vmem>>, vector<1x128xf32>
    %28 = vector.broadcast %27 : vector<1x128xf32> to vector<16x128xf32>
    %29 = arith.addf %26, %28 : vector<16x128xf32>
    %c0_23 = arith.constant 0 : index
    %c0_24 = arith.constant 0 : index
    %30 = vector.load %arg10[%c0_23, %c0_24] : memref<16x128xf32, #tpu.memory_space<vmem>>, vector<16x128xf32>
    tpu.vector_store %arg10[%c0_23, %c0_24], %29 {strides = array<i32>} : memref<16x128xf32, #tpu.memory_space<vmem>>, vector<16x128xf32>,
    return
  }
  func.func @transform_0(%arg0: i32) -> (i32, i32) {
    %c0_i32 = arith.constant 0 : i32
    %c0_i32_0 = arith.constant 0 : i32
    return %arg0, %c0_i32 : i32, i32
  }
  func.func @transform_1(%arg0: i32) -> (i32, i32) {
    %c0_i32 = arith.constant 0 : i32
    %c0_i32_0 = arith.constant 0 : i32
    %c0_i32_1 = arith.constant 0 : i32
    return %c0_i32, %c0_i32_0 : i32, i32
  }
  func.func @transform_2(%arg0: i32) -> (i32, i32) {
    %c0_i32 = arith.constant 0 : i32
    %c0_i32_0 = arith.constant 0 : i32
    %c0_i32_1 = arith.constant 0 : i32
    return %c0_i32, %c0_i32_0 : i32, i32
  }
  func.func @transform_3(%arg0: i32) -> (i32, i32) {
    %c0_i32 = arith.constant 0 : i32
    %c0_i32_0 = arith.constant 0 : i32
    %c0_i32_1 = arith.constant 0 : i32
    return %c0_i32, %c0_i32_0 : i32, i32
  }
  func.func @transform_4(%arg0: i32) -> (i32, i32) {
    %c0_i32 = arith.constant 0 : i32
    %c0_i32_0 = arith.constant 0 : i32
    %c0_i32_1 = arith.constant 0 : i32
    return %c0_i32, %c0_i32_0 : i32, i32
  }
  func.func @transform_5(%arg0: i32) -> (i32, i32) {
    %c0_i32 = arith.constant 0 : i32
    %c0_i32_0 = arith.constant 0 : i32
    %c0_i32_1 = arith.constant 0 : i32
    return %c0_i32, %c0_i32_0 : i32, i32
  }
  func.func @transform_6(%arg0: i32) -> (i32, i32) {
    %c0_i32 = arith.constant 0 : i32
    %c0_i32_0 = arith.constant 0 : i32
    %c0_i32_1 = arith.constant 0 : i32
    return %c0_i32, %c0_i32_0 : i32, i32
  }
  func.func @transform_7(%arg0: i32) -> (i32, i32) {
    %c0_i32 = arith.constant 0 : i32
    %c0_i32_0 = arith.constant 0 : i32
    %c0_i32_1 = arith.constant 0 : i32
    return %c0_i32, %c0_i32_0 : i32, i32
  }
  func.func @transform_8(%arg0: i32) -> (i32, i32) {
    %c0_i32 = arith.constant 0 : i32
    %c0_i32_0 = arith.constant 0 : i32
    %c0_i32_1 = arith.constant 0 : i32
    return %c0_i32, %c0_i32_0 : i32, i32
  }
  func.func @transform_9(%arg0: i32) -> (i32, i32) {
    %c0_i32 = arith.constant 0 : i32
    %c0_i32_0 = arith.constant 0 : i32
    return %arg0, %c0_i32 : i32, i32
  }
}

</mosaic_0001>

<bundles_post_ra>
// kernel: simple_nn_forward.1
= control target key start
LH: loop header
LB: loop body
LE: loop exit
PB: predicated region body
PF: predicated region fallthrough
CT: control target
= control target key end

     0   :  { %v1285_v1 = vmov 0   ;;  %vm110_vm0 = vcmask 261120   ;;  %vm1287_vm1 = vmmov 0   ;;  %s1661_s1 = inlined_call_operand.vmem [shape: bf16[32,512], index: 1, kind: input, shape index: {}]   ;;  %s1662_s0 = inlined_call_operand.vmem [shape: bf16[16,32], index: 0, kind: input, shape index: {}]   ;;  %s1663_s3 = inlined_call_operand.vmem [shape: bf16[512,256], index: 3, kind: input, shape index: {}]   ;;  %s1664_s5 = inlined_call_operand.vmem [shape: bf16[256,128], index: 5, kind: input, shape index: {}]   ;;  %s1665_s2 = inlined_call_operand.vmem [shape: f32[1,512], index: 2, kind: input, shape index: {}]   ;;  %s1666_s7 = inlined_call_operand.vmem [shape: bf16[128,128], index: 7, kind: input, shape index: {}]   ;;  %s1667_s4 = inlined_call_operand.vmem [shape: f32[1,256], index: 4, kind: input, shape index: {}]   ;;  %s1668_s6 = inlined_call_operand.vmem [shape: f32[1,128], index: 6, kind: input, shape index: {}]   ;;  %s1669_s8 = inlined_call_operand.vmem [shape: f32[1,128], index: 8, kind: input, shape index: {}]   ;;  %s1670_s9 = inlined_call_operand.vmem [shape: f32[16,128], index: 9, kind: output, shape index: {}]  }
   0x1   :  { %v1152_v0 = vld [vmem:[%s1661_s1 + $0x24] ss:$16 sps:$4 sm:$0xff]   ;;  %146 = vmatprep.mubr.bf16.mxu0 %v1285_v1  ;;  %189 = vmatprep.mubr.bf16.mxu1 %v1285_v1  ;;  %v1154_v2 = vld [vmem:[%s1661_s1 + $0x2c] ss:$16 sps:$4 sm:$0xff]   ;;  %v1156_v3 = vld [vmem:[%s1661_s1 + $0x20] ss:$16 sps:$4 sm:$0xff]  }
   0x2   :  { %126 = vmatprep.subr.bf16.mxu0 %v1152_v0  ;;  %v1157_v4 = vld [vmem:[%s1661_s1 + $0x28] ss:$16 sps:$4 sm:$0xff]   ;;  %169 = vmatprep.subr.bf16.mxu1 %v1154_v2  ;;  %v1158_v5 = vld [vmem:[%s1661_s1 + $0x4] ss:$16 sps:$4 sm:$0xff]   ;;  %v1160_v6 = vld [vmem:[%s1661_s1 + $0xc] ss:$16 sps:$4 sm:$0xff]  }
   0x3   :  { %127 = vmatpush1.bf16.msra.mxu0 %v1156_v3  ;;  %170 = vmatpush1.bf16.msra.mxu1 %v1157_v4  ;;  %v1162_v7 = vld [vmem:[%s1661_s1] ss:$16 sps:$4 sm:$0xff]   ;;  %v1163_v8 = vld [vmem:[%s1661_s1 + $0x8] ss:$16 sps:$4 sm:$0xff]   ;;  %v1167_v11 = vld [vmem:[%s1663_s3 + $0x74] ss:$8 sps:$4 sm:$0xff]  }
   0x4   :  { %128 = vmatprep.subr.bf16.mxu0 %v1158_v5  ;;  %171 = vmatprep.subr.bf16.mxu1 %v1160_v6  ;;  %v1164_v9 = vld [vmem:[%s1662_s0] sm:$0xff]   ;;  %v1165_v10 = vld [vmem:[%s1663_s3 + $0x70] ss:$8 sps:$4 sm:$0xff]   ;;  %v1170_v13 = vld [vmem:[%s1663_s3 + $0x174] ss:$8 sps:$4 sm:$0xff]  }
   0x5   :  { %v1168_v12 = vld [vmem:[%s1663_s3 + $0x170] ss:$8 sps:$4 sm:$0xff]   ;;  %v1173_v14 = vld [vmem:[%s1663_s3 + $0x64] ss:$8 sps:$4 sm:$0xff]   ;;  %v1171_v16 = vld [vmem:[%s1663_s3 + $0x60] ss:$8 sps:$4 sm:$0xff]  }
   0x6   :  { %v1176_v15 = vld [vmem:[%s1663_s3 + $0x164] ss:$8 sps:$4 sm:$0xff]   ;;  %v1174_v17 = vld [vmem:[%s1663_s3 + $0x160] ss:$8 sps:$4 sm:$0xff]   ;;  %v1179_v18 = vld [vmem:[%s1663_s3 + $0x54] ss:$8 sps:$4 sm:$0xff]  }
   0x7   :  { %129 = vmatpush1.bf16.msra.mxu0 %v1162_v7  ;;  %172 = vmatpush1.bf16.msra.mxu1 %v1163_v8  ;;  %v1182_v19 = vld [vmem:[%s1663_s3 + $0x154] ss:$8 sps:$4 sm:$0xff]   ;;  %v1177_v20 = vld [vmem:[%s1663_s3 + $0x50] ss:$8 sps:$4 sm:$0xff]   ;;  %v1185_v22 = vld [vmem:[%s1663_s3 + $0x44] ss:$8 sps:$4 sm:$0xff]  }
   0x8   :  { %608 = vmatprep.subr.bf16.mxu0 %v1167_v11  ;;  %651 = vmatprep.subr.bf16.mxu1 %v1170_v13  ;;  %v1180_v21 = vld [vmem:[%s1663_s3 + $0x150] ss:$8 sps:$4 sm:$0xff]   ;;  %v1188_v23 = vld [vmem:[%s1663_s3 + $0x144] ss:$8 sps:$4 sm:$0xff]   ;;  %v1183_v24 = vld [vmem:[%s1663_s3 + $0x40] ss:$8 sps:$4 sm:$0xff]   ;;  %v45_v11 = vlaneseq }
   0x9   :  { %v1186_v25 = vld [vmem:[%s1663_s3 + $0x140] ss:$8 sps:$4 sm:$0xff]   ;;  %v1191_v26 = vld [vmem:[%s1663_s3 + $0x34] ss:$8 sps:$4 sm:$0xff]   ;;  %v1189_v28 = vld [vmem:[%s1663_s3 + $0x30] ss:$8 sps:$4 sm:$0xff]  }
   0xa   :  { %1006 = vmatmul.mubr.msk.bf16.vlgmr.msra.gmra.mxu0 %vm110_vm0, %v1164_v9  ;;  %1007 = vmatmul.mubr.msk.bf16.vlgmr.msra.gmra.mxu1 %vm110_vm0, %v1164_v9  ;;  %v1194_v27 = vld [vmem:[%s1663_s3 + $0x134] ss:$8 sps:$4 sm:$0xff]   ;;  %v1192_v29 = vld [vmem:[%s1663_s3 + $0x130] ss:$8 sps:$4 sm:$0xff]   ;;  %v1197_v30 = vld [vmem:[%s1663_s3 + $0x24] ss:$8 sps:$4 sm:$0xff]  }
   0xb   :  { %609 = vmatpush1.bf16.msra.mxu0 %v1165_v10  ;;  %652 = vmatpush1.bf16.msra.mxu1 %v1168_v12  ;;  %v1200_v31 = vld [vmem:[%s1663_s3 + $0x124] ss:$8 sps:$4 sm:$0xff]   ;;  %v1195_v32 = vld [vmem:[%s1663_s3 + $0x20] ss:$8 sps:$4 sm:$0xff]   ;;  %v1203_v34 = vld [vmem:[%s1663_s3 + $0x14] ss:$8 sps:$4 sm:$0xff]  }
   0xc   :  { %610 = vmatprep.subr.bf16.mxu0 %v1173_v14  ;;  %653 = vmatprep.subr.bf16.mxu1 %v1176_v15  ;;  %v1198_v33 = vld [vmem:[%s1663_s3 + $0x120] ss:$8 sps:$4 sm:$0xff]   ;;  %v1206_v35 = vld [vmem:[%s1663_s3 + $0x114] ss:$8 sps:$4 sm:$0xff]   ;;  %v1201_v36 = vld [vmem:[%s1663_s3 + $0x10] ss:$8 sps:$4 sm:$0xff]  }
   0xd   :  { %v1204_v37 = vld [vmem:[%s1663_s3 + $0x110] ss:$8 sps:$4 sm:$0xff]   ;;  %v1209_v38 = vld [vmem:[%s1663_s3 + $0x4] ss:$8 sps:$4 sm:$0xff]   ;;  %v1207_v40 = vld [vmem:[%s1663_s3] ss:$8 sps:$4 sm:$0xff]  }
   0xe   :  { %v1212_v39 = vld [vmem:[%s1663_s3 + $0x104] ss:$8 sps:$4 sm:$0xff]   ;;  %v1210_v41 = vld [vmem:[%s1663_s3 + $0x100] ss:$8 sps:$4 sm:$0xff]   ;;  %v1215_v42 = vld [vmem:[%s1663_s3 + $0xf4] ss:$8 sps:$4 sm:$0xff]  }
   0xf   :  { %611 = vmatpush1.bf16.msra.mxu0 %v1171_v16  ;;  %654 = vmatpush1.bf16.msra.mxu1 %v1174_v17  ;;  %v1218_v43 = vld [vmem:[%s1663_s3 + $0x1f4] ss:$8 sps:$4 sm:$0xff]   ;;  %v1213_v44 = vld [vmem:[%s1663_s3 + $0xf0] ss:$8 sps:$4 sm:$0xff]   ;;  %v1221_v46 = vld [vmem:[%s1663_s3 + $0xe4] ss:$8 sps:$4 sm:$0xff]  }
  0x10   :  { %612 = vmatprep.subr.bf16.mxu0 %v1179_v18  ;;  %655 = vmatprep.subr.bf16.mxu1 %v1182_v19  ;;  %v1216_v45 = vld [vmem:[%s1663_s3 + $0x1f0] ss:$8 sps:$4 sm:$0xff]   ;;  %v1224_v47 = vld [vmem:[%s1663_s3 + $0x1e4] ss:$8 sps:$4 sm:$0xff]   ;;  %v1219_v48 = vld [vmem:[%s1663_s3 + $0xe0] ss:$8 sps:$4 sm:$0xff]  }
  0x11   :  { %v1222_v49 = vld [vmem:[%s1663_s3 + $0x1e0] ss:$8 sps:$4 sm:$0xff]   ;;  %v1227_v50 = vld [vmem:[%s1663_s3 + $0xd4] ss:$8 sps:$4 sm:$0xff]   ;;  %v1225_v52 = vld [vmem:[%s1663_s3 + $0xd0] ss:$8 sps:$4 sm:$0xff]  }
  0x12   :  { %v1230_v51 = vld [vmem:[%s1663_s3 + $0x1d4] ss:$8 sps:$4 sm:$0xff]   ;;  %v1228_v53 = vld [vmem:[%s1663_s3 + $0x1d0] ss:$8 sps:$4 sm:$0xff]   ;;  %v1233_v54 = vld [vmem:[%s1663_s3 + $0xc4] ss:$8 sps:$4 sm:$0xff]  }
  0x13   :  { %613 = vmatpush1.bf16.msra.mxu0 %v1177_v20  ;;  %656 = vmatpush1.bf16.msra.mxu1 %v1180_v21  ;;  %v1236_v55 = vld [vmem:[%s1663_s3 + $0x1c4] ss:$8 sps:$4 sm:$0xff]   ;;  %v1231_v56 = vld [vmem:[%s1663_s3 + $0xc0] ss:$8 sps:$4 sm:$0xff]   ;;  %v1239_v58 = vld [vmem:[%s1663_s3 + $0xb4] ss:$8 sps:$4 sm:$0xff]  }
  0x14   :  { %614 = vmatprep.subr.bf16.mxu0 %v1185_v22  ;;  %657 = vmatprep.subr.bf16.mxu1 %v1188_v23  ;;  %v1234_v57 = vld [vmem:[%s1663_s3 + $0x1c0] ss:$8 sps:$4 sm:$0xff]   ;;  %v1242_v59 = vld [vmem:[%s1663_s3 + $0x1b4] ss:$8 sps:$4 sm:$0xff]   ;;  %v1237_v60 = vld [vmem:[%s1663_s3 + $0xb0] ss:$8 sps:$4 sm:$0xff]  }
  0x15   :  { %v1240_v61 = vld [vmem:[%s1663_s3 + $0x1b0] ss:$8 sps:$4 sm:$0xff]   ;;  %v1245_v62 = vld [vmem:[%s1663_s3 + $0xa4] ss:$8 sps:$4 sm:$0xff]   ;;  %v1243_v0 = vld [vmem:[%s1663_s3 + $0xa0] ss:$8 sps:$4 sm:$0xff]  }
  0x16   :  { %v1248_v63 = vld [vmem:[%s1663_s3 + $0x1a4] ss:$8 sps:$4 sm:$0xff]   ;;  %v1246_v1 = vld [vmem:[%s1663_s3 + $0x1a0] ss:$8 sps:$4 sm:$0xff]   ;;  %v1251_v2 = vld [vmem:[%s1663_s3 + $0x94] ss:$8 sps:$4 sm:$0xff]  }
  0x17   :  { %615 = vmatpush1.bf16.msra.mxu0 %v1183_v24  ;;  %658 = vmatpush1.bf16.msra.mxu1 %v1186_v25  ;;  %v1254_v3 = vld [vmem:[%s1663_s3 + $0x194] ss:$8 sps:$4 sm:$0xff]   ;;  %v1249_v4 = vld [vmem:[%s1663_s3 + $0x90] ss:$8 sps:$4 sm:$0xff]   ;;  %v1257_v6 = vld [vmem:[%s1663_s3 + $0x84] ss:$8 sps:$4 sm:$0xff]  }
  0x18   :  { %616 = vmatprep.subr.bf16.mxu0 %v1191_v26  ;;  %659 = vmatprep.subr.bf16.mxu1 %v1194_v27  ;;  %v1252_v5 = vld [vmem:[%s1663_s3 + $0x190] ss:$8 sps:$4 sm:$0xff]   ;;  %v1260_v7 = vld [vmem:[%s1663_s3 + $0x184] ss:$8 sps:$4 sm:$0xff]   ;;  %v1255_v8 = vld [vmem:[%s1663_s3 + $0x80] ss:$8 sps:$4 sm:$0xff]  }
  0x19   :  { %v1258_v9 = vld [vmem:[%s1663_s3 + $0x180] ss:$8 sps:$4 sm:$0xff]   ;;  %v1261_v10 = vld [vmem:[%s1664_s5 + $0x78] sm:$0xff]   ;;  %v1560_v12 = vshrl.u32 %v45_v11, 7 }
  0x1a   :  { %v43_v17 = vld [vmem:[%s1665_s2] sm:$0xf] }
  0x1b   :  { %617 = vmatpush1.bf16.msra.mxu0 %v1189_v28  ;;  %660 = vmatpush1.bf16.msra.mxu1 %v1192_v29  ;;  %v51_v13 = vsub.s32 1, %v1560_v12  ;;  %v59_v14 = vsub.s32 3, %v1560_v12  ;;  %v47_v15 = vsub.s32 0, %v1560_v12  ;;  %v55_v16 = vsub.s32 2, %v1560_v12 }
  0x1c   :  { %618 = vmatprep.subr.bf16.mxu0 %v1197_v30  ;;  %661 = vmatprep.subr.bf16.mxu1 %v1200_v31 }
  0x1d   :  { %v52_v20 = vrot.slane %v43_v17, %v51_v13  ;;  %v60_v21 = vrot.slane %v43_v17, %v59_v14  ;;  %v48_v22 = vrot.slane %v43_v17, %v47_v15  ;;  %v56_v23 = vrot.slane %v43_v17, %v55_v16 }
  0x1f   :  { %619 = vmatpush1.bf16.msra.mxu0 %v1195_v32  ;;  %662 = vmatpush1.bf16.msra.mxu1 %v1198_v33 }
  0x20   :  { %620 = vmatprep.subr.bf16.mxu0 %v1203_v34  ;;  %663 = vmatprep.subr.bf16.mxu1 %v1206_v35 }
  0x23   :  { %621 = vmatpush1.bf16.msra.mxu0 %v1201_v36  ;;  %664 = vmatpush1.bf16.msra.mxu1 %v1204_v37 }
  0x24   :  { %622 = vmatprep.subr.bf16.mxu0 %v1209_v38  ;;  %665 = vmatprep.subr.bf16.mxu1 %v1212_v39 }
  0x27   :  { %623 = vmatpush1.bf16.msra.mxu0 %v1207_v40  ;;  %666 = vmatpush1.bf16.msra.mxu1 %v1210_v41 }
  0x28   :  { %624 = vmatprep.subr.bf16.mxu0 %v1215_v42  ;;  %667 = vmatprep.subr.bf16.mxu1 %v1218_v43 }
  0x2b   :  { %625 = vmatpush2.bf16.msra.mxu0 %v1213_v44  ;;  %668 = vmatpush2.bf16.msra.mxu1 %v1216_v45 }
  0x2c   :  { %626 = vmatprep.subr.bf16.mxu0 %v1221_v46  ;;  %669 = vmatprep.subr.bf16.mxu1 %v1224_v47 }
  0x2f   :  { %627 = vmatpush2.bf16.msra.mxu0 %v1219_v48  ;;  %670 = vmatpush2.bf16.msra.mxu1 %v1222_v49  ;;  %v1262_v48 = vld [vmem:[%s1664_s5 + $0x38] sm:$0xff]  }
  0x30   :  { %628 = vmatprep.subr.bf16.mxu0 %v1227_v50  ;;  %671 = vmatprep.subr.bf16.mxu1 %v1230_v51  ;;  %v1263_v51 = vld [vmem:[%s1664_s5 + $0x70] sm:$0xff]  }
  0x33   :  { %629 = vmatpush2.bf16.msra.mxu0 %v1225_v52  ;;  %672 = vmatpush2.bf16.msra.mxu1 %v1228_v53  ;;  %v1264_v52 = vld [vmem:[%s1664_s5 + $0x30] sm:$0xff]   ;;  %v1265_v53 = vld [vmem:[%s1664_s5 + $0x68] sm:$0xff]  }
  0x34   :  { %630 = vmatprep.subr.bf16.mxu0 %v1233_v54  ;;  %673 = vmatprep.subr.bf16.mxu1 %v1236_v55  ;;  %v1266_v54 = vld [vmem:[%s1664_s5 + $0x28] sm:$0xff]   ;;  %v1267_v55 = vld [vmem:[%s1664_s5 + $0x60] sm:$0xff]  }
  0x37   :  { %631 = vmatpush2.bf16.msra.mxu0 %v1231_v56  ;;  %674 = vmatpush2.bf16.msra.mxu1 %v1234_v57  ;;  %v1268_v56 = vld [vmem:[%s1664_s5 + $0x20] sm:$0xff]   ;;  %v1269_v57 = vld [vmem:[%s1664_s5 + $0x58] sm:$0xff]  }
  0x38   :  { %632 = vmatprep.subr.bf16.mxu0 %v1239_v58  ;;  %675 = vmatprep.subr.bf16.mxu1 %v1242_v59  ;;  %v1270_v58 = vld [vmem:[%s1664_s5 + $0x18] sm:$0xff]   ;;  %v1271_v59 = vld [vmem:[%s1664_s5 + $0x50] sm:$0xff]  }
  0x3b   :  { %633 = vmatpush2.bf16.msra.mxu0 %v1237_v60  ;;  %676 = vmatpush2.bf16.msra.mxu1 %v1240_v61  ;;  %v1272_v60 = vld [vmem:[%s1664_s5 + $0x10] sm:$0xff]   ;;  %v1273_v61 = vld [vmem:[%s1664_s5 + $0x48] sm:$0xff]  }
  0x3c   :  { %634 = vmatprep.subr.bf16.mxu0 %v1245_v62  ;;  %677 = vmatprep.subr.bf16.mxu1 %v1248_v63  ;;  %v1274_v62 = vld [vmem:[%s1664_s5 + $0x8] sm:$0xff]   ;;  %v1275_v63 = vld [vmem:[%s1664_s5 + $0x40] sm:$0xff]  }
  0x3f   :  { %635 = vmatpush2.bf16.msra.mxu0 %v1243_v0  ;;  %678 = vmatpush2.bf16.msra.mxu1 %v1246_v1  ;;  %v1276_v0 = vld [vmem:[%s1664_s5] sm:$0xff]   ;;  %v1286_v1 = vmov 0.0  }
  0x40   :  { %636 = vmatprep.subr.bf16.mxu0 %v1251_v2  ;;  %679 = vmatprep.subr.bf16.mxu1 %v1254_v3  ;;  %v1277_v2 = vld [vmem:[%s1666_s7 + $0x38] sm:$0xff]   ;;  %v1278_v3 = vld [vmem:[%s1666_s7 + $0x30] sm:$0xff]  }
  0x43   :  { %637 = vmatpush2.bf16.msra.mxu0 %v1249_v4  ;;  %680 = vmatpush2.bf16.msra.mxu1 %v1252_v5  ;;  %v1279_v4 = vld [vmem:[%s1666_s7 + $0x28] sm:$0xff]   ;;  %v1280_v5 = vld [vmem:[%s1666_s7 + $0x20] sm:$0xff]  }
  0x44   :  { %638 = vmatprep.subr.bf16.mxu0 %v1257_v6  ;;  %681 = vmatprep.subr.bf16.mxu1 %v1260_v7  ;;  %v276_v6 = vld [vmem:[%s1667_s4] sm:$0x3] }
  0x45   :  { %v285_v7 = vrot.slane %v276_v6, %v51_v13 }
  0x47   :  { %639 = vmatpush2.bf16.msra.mxu0 %v1255_v8  ;;  %682 = vmatpush2.bf16.msra.mxu1 %v1258_v9  ;;  %v281_v8 = vrot.slane %v276_v6, %v47_v15 }
  0x48   :  { %1098 = vmatprep.subr.bf16.mxu0 %v1261_v10  ;;  %1129 = vmatprep.subr.bf16.mxu1 %v1286_v1 }
  0xca   :  { %v148_v18 = vpop.f32.mrf.mxu0  ;;  %v191_v19 = vpop.f32.mrf.mxu1 }
  0xcb   :  { %v149_v32 = vadd.f32 %v148_v18, %v48_v22  ;;  %v192_v33 = vadd.f32 %v191_v19, %v56_v23 }
  0xcc   :  { %v150_v24 = vpop.f32.mrf.mxu0  ;;  %v193_v25 = vpop.f32.mrf.mxu1 }
  0xcd   :  { %v151_v28 = vadd.f32 %v150_v24, %v52_v20  ;;  %v194_v29 = vadd.f32 %v193_v25, %v60_v21  ;;  %v200_v44 = vmax.f32 %v149_v32, 0.0  ;;  %v202_v45 = vmax.f32 %v192_v33, 0.0  ;;  %v1282_v32 = vld [vmem:[%s1666_s7 + $0x10] sm:$0xff]   ;;  %v1283_v33 = vld [vmem:[%s1666_s7 + $0x8] sm:$0xff]  }
  0xce   :  { %v152_v26 = vpop.f32.mrf.mxu0  ;;  %v195_v27 = vpop.f32.mrf.mxu1 }
  0xcf   :  { %v153_v30 = vadd.f32 %v152_v26, %v48_v22  ;;  %v196_v31 = vadd.f32 %v195_v27, %v56_v23  ;;  %v201_v40 = vmax.f32 %v151_v28, 0.0  ;;  %v203_v41 = vmax.f32 %v194_v29, 0.0 }
  0xd0   :  { %v154_v34 = vpop.f32.mrf.mxu0  ;;  %v197_v35 = vpop.f32.mrf.mxu1 }
  0xd1   :  { %v155_v36 = vadd.f32 %v154_v34, %v52_v20  ;;  %v198_v37 = vadd.f32 %v197_v35, %v60_v21  ;;  %v204_v38 = vmax.f32 %v153_v30, 0.0  ;;  %v206_v39 = vmax.f32 %v196_v31, 0.0  ;;  %v1281_v31 = vld [vmem:[%s1666_s7 + $0x18] sm:$0xff]   ;;  %v1284_v34 = vld [vmem:[%s1666_s7] sm:$0xff]  }
  0xd3   :  { %v205_v42 = vmax.f32 %v155_v36, 0.0  ;;  %v207_v43 = vmax.f32 %v198_v37, 0.0  ;;  %v208_v49 = vpack.c.bf16 %v204_v38, %v200_v44  ;;  %v210_v50 = vpack.c.bf16 %v206_v39, %v202_v45  ;;  %v1072_v38 = vld [vmem:[%s1668_s6] ss:$0 sm:$0xff] }
  0xd5   :  { %v209_v46 = vpack.c.bf16 %v205_v42, %v201_v40  ;;  %v211_v47 = vpack.c.bf16 %v207_v43, %v203_v41 }
  0xd7   :  { %640 = vmatprep.mubr.bf16.mxu0 %v209_v46  ;;  %683 = vmatprep.mubr.bf16.mxu1 %v211_v47  ;;  %v1089_v47 = vld [vmem:[%s1669_s8] ss:$0 sm:$0xff] }
  0xd8   :  { %641 = vmatmul.mubr.bf16.vlgmr.msra.gmra.mxu0 %v208_v49  ;;  %684 = vmatmul.mubr.bf16.vlgmr.msra.gmra.mxu1 %v210_v50 }
  0xd9   :  { %1099 = vmatpush3.bf16.msra.mxu0 %v1262_v48  ;;  %1130 = vmatpush3.bf16.msra.mxu1 %v1277_v2 }
  0xda   :  { %1100 = vmatprep.subr.bf16.mxu0 %v1263_v51  ;;  %1131 = vmatprep.subr.bf16.mxu1 %v1286_v1 }
  0xdb   :  { %1145 = vmatprep.mubr.msk.bf16.mxu1 %vm1287_vm1, %v1286_v1 }
  0xdd   :  { %1101 = vmatpush3.bf16.msra.mxu0 %v1264_v52  ;;  %1132 = vmatpush3.bf16.msra.mxu1 %v1278_v3 }
  0xde   :  { %1102 = vmatprep.subr.bf16.mxu0 %v1265_v53  ;;  %1133 = vmatprep.subr.bf16.mxu1 %v1286_v1 }
  0xe1   :  { %1103 = vmatpush3.bf16.msra.mxu0 %v1266_v54  ;;  %1134 = vmatpush3.bf16.msra.mxu1 %v1279_v4 }
  0xe2   :  { %1104 = vmatprep.subr.bf16.mxu0 %v1267_v55  ;;  %1135 = vmatprep.subr.bf16.mxu1 %v1286_v1 }
  0xe5   :  { %1105 = vmatpush3.bf16.msra.mxu0 %v1268_v56  ;;  %1136 = vmatpush3.bf16.msra.mxu1 %v1280_v5 }
  0xe6   :  { %1106 = vmatprep.subr.bf16.mxu0 %v1269_v57  ;;  %1137 = vmatprep.subr.bf16.mxu1 %v1286_v1 }
  0xe9   :  { %1107 = vmatpush3.bf16.msra.mxu0 %v1270_v58  ;;  %1138 = vmatpush3.bf16.msra.mxu1 %v1281_v31 }
  0xea   :  { %1108 = vmatprep.subr.bf16.mxu0 %v1271_v59  ;;  %1139 = vmatprep.subr.bf16.mxu1 %v1286_v1 }
  0xed   :  { %1109 = vmatpush3.bf16.msra.mxu0 %v1272_v60  ;;  %1140 = vmatpush3.bf16.msra.mxu1 %v1282_v32 }
  0xee   :  { %1110 = vmatprep.subr.bf16.mxu0 %v1273_v61  ;;  %1141 = vmatprep.subr.bf16.mxu1 %v1286_v1 }
  0xf1   :  { %1111 = vmatpush3.bf16.msra.mxu0 %v1274_v62  ;;  %1142 = vmatpush3.bf16.msra.mxu1 %v1283_v33 }
  0xf2   :  { %1112 = vmatprep.subr.bf16.mxu0 %v1275_v63  ;;  %1143 = vmatprep.subr.bf16.mxu1 %v1286_v1 }
  0xf5   :  { %1113 = vmatpush3.bf16.msra.mxu0 %v1276_v0  ;;  %1144 = vmatpush3.bf16.msra.mxu1 %v1284_v34 }
 0x198   :  { %v642_v9 = vpop.f32.mrf.mxu0  ;;  %v685_v10 = vpop.f32.mrf.mxu1 }
 0x199   :  { %v643_v17 = vadd.f32 %v642_v9, %v281_v8 }
 0x19a   :  { %v644_v11 = vpop.f32.mrf.mxu0  ;;  %v687_v14 = vpop.f32.mrf.mxu1 }
 0x19b   :  { %v645_v16 = vadd.f32 %v644_v11, %v285_v7  ;;  %v686_v25 = vadd.f32 %v685_v10, %v643_v17 }
 0x19c   :  { %v646_v18 = vpop.f32.mrf.mxu0  ;;  %v689_v19 = vpop.f32.mrf.mxu1 }
 0x19d   :  { %v647_v20 = vadd.f32 %v646_v18, %v281_v8  ;;  %v688_v22 = vadd.f32 %v687_v14, %v645_v16  ;;  %v694_v15 = vmax.f32 %v686_v25, 0.0 }
 0x19e   :  { %v648_v21 = vpop.f32.mrf.mxu0  ;;  %v691_v26 = vpop.f32.mrf.mxu1 }
 0x19f   :  { %v690_v23 = vadd.f32 %v689_v19, %v647_v20  ;;  %v649_v24 = vadd.f32 %v648_v21, %v285_v7  ;;  %v695_v28 = vmax.f32 %v688_v22, 0.0 }
 0x1a1   :  { %v692_v27 = vadd.f32 %v691_v26, %v649_v24  ;;  %v696_v13 = vmax.f32 %v690_v23, 0.0 }
 0x1a3   :  { %v697_v12 = vmax.f32 %v692_v27, 0.0  ;;  %v698_v30 = vpack.c.bf16 %v696_v13, %v694_v15 }
 0x1a5   :  { %v699_v29 = vpack.c.bf16 %v697_v12, %v695_v28 }
 0x1a7   :  { %867 = vmatprep.mubr.bf16.mxu0 %v699_v29 }
 0x1a8   :  { %868 = vmatmul.mubr.bf16.vlgmr.msra.gmra.mxu0 %v698_v30 }
 0x268   :  { %v1114_v35 = vpop.f32.mrf.mxu0 }
 0x26a   :  { %v1115_v36 = vpop.f32.mrf.mxu0 }
 0x26b   :  { %v1116_v37 = vadd.f32 %v1115_v36, %v1114_v35 }
 0x26c   :  { %v1117_v39 = vpop.f32.mrf.mxu0 }
 0x26d   :  { %v870_v41 = vadd.f32 %v1116_v37, %v1072_v38 }
 0x26e   :  { %v1118_v40 = vpop.f32.mrf.mxu0 }
 0x26f   :  { %v1119_v42 = vadd.f32 %v1118_v40, %v1117_v39  ;;  %v876_v44 = vmax.f32 %v870_v41, 0.0 }
 0x271   :  { %v873_v43 = vadd.f32 %v1119_v42, %v1072_v38 }
 0x273   :  { %v877_v45 = vmax.f32 %v873_v43, 0.0 }
 0x275   :  { %v878_v46 = vpack.c.bf16 %v877_v45, %v876_v44 }
 0x277   :  { %1146 = vmatmul.mubr.bf16.vlgmr.msra.gmra.mxu1 %v878_v46 }
 0x337   :  { %v984_v48 = vpop.f32.mrf.mxu1 }
 0x338   :  { %v985_v49 = vadd.f32 %v1089_v47, %v984_v48 }
 0x339   :  { %v1147_v50 = vpop.f32.mrf.mxu1 }
 0x33a   :  { %991 = vst [vmem:[%s1670_s9] sm:$0xff] %v985_v49 }
 0x33b   :  { %v987_v51 = vpop.f32.mrf.mxu1 }
 0x33c   :  { %v988_v52 = vadd.f32 %v1089_v47, %v987_v51 }
 0x33d   :  { %v1148_v53 = vpop.f32.mrf.mxu1 }
 0x33e   :  { %992 = vst [vmem:[%s1670_s9 + $0x8] sm:$0xff] %v988_v52 }

</bundles_post_ra>
